<compile_context>
chip_gen: v5e
topology: v5e:2x2
jax: 0.10.0
libtpu: 0.0.40
codegen_flags: <defaults>
</compile_context>

<pallas_src>
import functools

import jax
import jax.numpy as jnp
from jax.experimental import pallas as pl
from jax.experimental.pallas import tpu as pltpu


def _focal_loss_kernel(x_ref, t_ref, a_ref, o_ref, *,
                       gamma, n_rows, class_axis, mask_tail):
    """One batch tile.  class_axis=0 -> (C, tile_n) layout, 1 -> (tile_n, C)."""
    x = x_ref[...].astype(jnp.float32)      # logits tile
    t = t_ref[...]                          # int32 class ids, (1,T) or (T,1)
    alpha_t = a_ref[...].astype(jnp.float32)  # alpha[target] per row

    # one-hot class mask (equivalent of scatter_(1, ids, 1.0))
    cls_ids = jax.lax.broadcasted_iota(jnp.int32, x.shape, class_axis)
    one_hot = (cls_ids == t).astype(jnp.float32)

    # log-softmax gather: log_p = x[class] - m - logsumexp(x - m)  (<= 0)
    m = jnp.max(x, axis=class_axis, keepdims=True)
    xs = x - m
    lse = jnp.log(jnp.sum(jnp.exp(xs), axis=class_axis, keepdims=True))
    x_t = jnp.sum(xs * one_hot, axis=class_axis, keepdims=True)
    log_p = x_t - lse
    probs = jnp.exp(log_p)                  # in (0, 1]
    w = 1.0 - probs                         # >= 0

    # (1 - p)^gamma: multiply chain for integer gamma (no transcendentals).
    if float(gamma).is_integer() and gamma >= 0:
        g = int(gamma)
        focal = jnp.ones_like(w) if g == 0 else w
        for _ in range(max(g - 1, 0)):
            focal = focal * w
    else:
        focal = jnp.power(jnp.maximum(w, 0.0), float(gamma))

    batch_loss = -alpha_t * focal * log_p   # (1, tile_n) or (tile_n, 1)

    if mask_tail:
        # Only the last (partial) tile has rows >= n_rows.  Garbage logits in
        # padded rows may produce inf/NaN intermediates; jnp.where does not
        # propagate NaN from the unselected branch, so masking here is exact.
        batch_axis = 1 - class_axis
        tile_rows = x.shape[batch_axis]
        row = (pl.program_id(0) * tile_rows
               + jax.lax.broadcasted_iota(jnp.int32, batch_loss.shape, batch_axis))
        batch_loss = jnp.where(row < n_rows, batch_loss, 0.0)

    o_ref[...] = batch_loss


def focal_loss(inputs, targets, alpha=None, gamma=2.0, size_average=True,
               max_tile_rows=None):
    """inputs: (N, C) float logits (f32 or bf16); targets: (N,) int class ids."""
    N, C = inputs.shape
    if alpha is None:
        alpha_vec = jnp.ones((C,), dtype=jnp.float32)   # torch.ones(class_num, 1)
    else:
        alpha_vec = jnp.asarray(alpha, dtype=jnp.float32).reshape(-1)
    tgt = targets.astype(jnp.int32)
    alpha_t = alpha_vec[tgt]                             # (N,) gathered in wrapper

    in_bytes = jnp.dtype(inputs.dtype).itemsize
    use_cn = C < 128            # lane-dense transposed layout for small C
    lane_mult = 128 if use_cn else 8

    # Tile sizing from a VMEM budget: ~2 MiB of f32 working copy per tile.
    target_tile_bytes = 2 << 20
    t_rows = max(target_tile_bytes // (C * 4), lane_mult)
    if max_tile_rows is not None:
        t_rows = min(t_rows, int(max_tile_rows))
    if t_rows >= N:
        tile_n = N                                       # single full-extent tile
    else:
        tile_n = max((t_rows // lane_mult) * lane_mult, lane_mult)
    num_tiles = pl.cdiv(N, tile_n)
    mask_tail = (N % tile_n) != 0

    # VMEM limit = double-buffered inputs/outputs + ~8 live f32 temporaries
    # of the logits tile + slack; capped at 48 MiB (v7x TC has 64 MiB total).
    tile_x_in = tile_n * C * in_bytes
    tile_vec = tile_n * 4
    vmem_need = 2 * (tile_x_in + 3 * tile_vec) + 8 * tile_n * C * 4 + (2 << 20)
    vmem_limit = int(min(max(vmem_need, 16 << 20), 48 << 20))

    kernel = functools.partial(
        _focal_loss_kernel,
        gamma=float(gamma),
        n_rows=N,
        class_axis=0 if use_cn else 1,
        mask_tail=mask_tail,
    )

    if use_cn:
        # Transposed (C, N) layout: batch axis is the 128-lane axis.
        x = inputs.T                                     # (C, N)
        t2 = tgt.reshape(1, N)
        a2 = alpha_t.reshape(1, N)
        in_specs = [
            pl.BlockSpec((C, tile_n), lambda i: (0, i)),     # logits tile
            pl.BlockSpec((1, tile_n), lambda i: (0, i)),     # targets (lane-dense)
            pl.BlockSpec((1, tile_n), lambda i: (0, i)),     # alpha[target]
        ]
        out_shape = jax.ShapeDtypeStruct((1, N), jnp.float32)
        out_specs = pl.BlockSpec((1, tile_n), lambda i: (0, i))  # lane-dense losses
        args = (x, t2, a2)
    else:
        x = inputs                                       # (N, C)
        t2 = tgt.reshape(N, 1)
        a2 = alpha_t.reshape(N, 1)
        in_specs = [
            pl.BlockSpec((tile_n, C), lambda i: (i, 0)),
            pl.BlockSpec((tile_n, 1), lambda i: (i, 0)),
            pl.BlockSpec((tile_n, 1), lambda i: (i, 0)),
        ]
        out_shape = jax.ShapeDtypeStruct((N, 1), jnp.float32)
        out_specs = pl.BlockSpec((tile_n, 1), lambda i: (i, 0))
        args = (x, t2, a2)

    per_row = pl.pallas_call(
        kernel,
        out_shape=out_shape,
        grid=(num_tiles,),
        in_specs=in_specs,
        out_specs=out_specs,
        compiler_params=pltpu.CompilerParams(
            dimension_semantics=("parallel",),   # independent tiles -> both v7x TCs
            vmem_limit_bytes=vmem_limit,
        ),
    )(*args)

    total = jnp.sum(per_row)
    return total / N if size_average else total


def _focal_loss_ref(inputs, targets, alpha=None, gamma=2.0, size_average=True):
    N, C = inputs.shape
    if alpha is None:
        alpha = jnp.ones((C,), dtype=jnp.float32)
    alpha = jnp.asarray(alpha, dtype=jnp.float32).reshape(-1)
    p = jax.nn.softmax(inputs.astype(jnp.float32), axis=1)
    mask = jax.nn.one_hot(targets, C, dtype=jnp.float32)
    probs = jnp.sum(p * mask, axis=1)
    a = alpha[targets]
    batch_loss = -a * (1.0 - probs) ** gamma * jnp.log(probs)
    return jnp.mean(batch_loss) if size_average else jnp.sum(batch_loss)


if __name__ == "__main__":
    key = jax.random.PRNGKey(0)
    k1, k2, k3, k4 = jax.random.split(key, 4)

    # 1) Small shape consistent with the module (batch=8, class_num=32),
    #    exercises the lane-dense transposed (C, N) path, default gamma=2/mean.
    N, C = 8, 32
    inputs = jax.random.normal(k1, (N, C), dtype=jnp.float32)
    targets = jax.random.randint(k2, (N,), 0, C, dtype=jnp.int32)
    loss = focal_loss(inputs, targets, alpha=None, gamma=2.0, size_average=True)
    jax.block_until_ready(loss)
    ref = _focal_loss_ref(inputs, targets, alpha=None, gamma=2.0, size_average=True)
    assert jnp.allclose(loss, ref, atol=1e-5, rtol=1e-4), (loss, ref)

    # 2) Multi-tile + partial-last-tile + sum reduction on the transposed path
    #    (tile forced small so the tiling/masking path is exercised at small N).
    N2, C2 = 1040, 32
    inputs2 = jax.random.normal(k3, (N2, C2), dtype=jnp.float32)
    targets2 = jax.random.randint(k4, (N2,), 0, C2, dtype=jnp.int32)
    loss2 = focal_loss(inputs2, targets2, gamma=2.0, size_average=False,
                       max_tile_rows=256)
    jax.block_until_ready(loss2)
    ref2 = _focal_loss_ref(inputs2, targets2, gamma=2.0, size_average=False)
    assert jnp.allclose(loss2, ref2, atol=1e-3, rtol=1e-4), (loss2, ref2)

    # 3) Row-major (N, C) path for C >= 128, with custom alpha and gamma=3,
    #    multi-tile + partial last tile.
    k5, k6, k7 = jax.random.split(k1, 3)
    N3, C3 = 272, 256
    inputs3 = jax.random.normal(k5, (N3, C3), dtype=jnp.float32)
    targets3 = jax.random.randint(k6, (N3,), 0, C3, dtype=jnp.int32)
    alpha3 = jax.random.uniform(k7, (C3,), jnp.float32, 0.5, 1.5)
    loss3 = focal_loss(inputs3, targets3, alpha=alpha3, gamma=3.0,
                       size_average=True, max_tile_rows=128)
    jax.block_until_ready(loss3)
    ref3 = _focal_loss_ref(inputs3, targets3, alpha=alpha3, gamma=3.0,
                           size_average=True)
    assert jnp.allclose(loss3, ref3, atol=1e-4, rtol=1e-4), (loss3, ref3)

    # 4) bf16 ingest (halves HBM traffic on v5e); reference on the upcast values.
    inputs_bf16 = inputs.astype(jnp.bfloat16)
    loss_b = focal_loss(inputs_bf16, targets)
    jax.block_until_ready(loss_b)
    ref_b = _focal_loss_ref(inputs_bf16.astype(jnp.float32), targets)
    assert jnp.allclose(loss_b, ref_b, atol=1e-4, rtol=1e-3), (loss_b, ref_b)

    print("KERNEL_OK")
</pallas_src>

<mosaic_0001>
module attributes {stable_mosaic.version = 11 : i64} {
  func.func @_focal_loss_kernel(%arg0: i32, %arg1: memref<32x8xf32, #tpu.memory_space<vmem>>, %arg2: memref<1x8xi32, #tpu.memory_space<vmem>>, %arg3: memref<1x8xf32, #tpu.memory_space<vmem>>, %arg4: memref<1x8xf32, #tpu.memory_space<vmem>>) attributes {dimension_semantics = [#tpu.dimension_semantics<parallel>], iteration_bounds = array<i64: 1>, scalar_prefetch = 0 : i64, scratch_operands = 0 : i64, tpu.core_type = #tpu.core_type<tc>, window_params = [{transform_indices = @transform_0, window_bounds = array<i64: 32, 8>}, {transform_indices = @transform_1, window_bounds = array<i64: 1, 8>}, {transform_indices = @transform_2, window_bounds = array<i64: 1, 8>}, {transform_indices = @transform_3, window_bounds = array<i64: 1, 8>}]} {
    %c0 = arith.constant 0 : index
    %c0_0 = arith.constant 0 : index
    %0 = vector.load %arg1[%c0, %c0_0] : memref<32x8xf32, #tpu.memory_space<vmem>>, vector<32x8xf32>
    %c0_1 = arith.constant 0 : index
    %c0_2 = arith.constant 0 : index
    %1 = vector.load %arg2[%c0_1, %c0_2] : memref<1x8xi32, #tpu.memory_space<vmem>>, vector<1x8xi32>
    %c0_3 = arith.constant 0 : index
    %c0_4 = arith.constant 0 : index
    %2 = vector.load %arg3[%c0_3, %c0_4] : memref<1x8xf32, #tpu.memory_space<vmem>>, vector<1x8xf32>
    %3 = tpu.iota {dimensions = array<i32: 0>} : vector<32x8xi32>
    %4 = vector.broadcast %1 : vector<1x8xi32> to vector<32x8xi32>
    %5 = arith.cmpi eq, %3, %4 : vector<32x8xi32>
    %6 = arith.extui %5 : vector<32x8xi1> to vector<32x8xi32>
    %7 = arith.sitofp %6 : vector<32x8xi32> to vector<32x8xf32>
    %cst = arith.constant dense<0xFF800000> : vector<8xf32>
    %8 = vector.multi_reduction <maximumf>, %0, %cst [0] : vector<32x8xf32> to vector<8xf32>
    %9 = vector.shape_cast %8 : vector<8xf32> to vector<1x8xf32>
    %10 = vector.broadcast %9 : vector<1x8xf32> to vector<32x8xf32>
    %11 = arith.subf %0, %10 : vector<32x8xf32>
    %12 = math.exp %11 : vector<32x8xf32>
    %cst_5 = arith.constant dense<0.000000e+00> : vector<8xf32>
    %13 = vector.multi_reduction <add>, %12, %cst_5 [0] : vector<32x8xf32> to vector<8xf32>
    %14 = vector.shape_cast %13 : vector<8xf32> to vector<1x8xf32>
    %15 = math.log %14 : vector<1x8xf32>
    %16 = arith.mulf %11, %7 : vector<32x8xf32>
    %cst_6 = arith.constant dense<0.000000e+00> : vector<8xf32>
    %17 = vector.multi_reduction <add>, %16, %cst_6 [0] : vector<32x8xf32> to vector<8xf32>
    %18 = vector.shape_cast %17 : vector<8xf32> to vector<1x8xf32>
    %19 = arith.subf %18, %15 : vector<1x8xf32>
    %20 = math.exp %19 : vector<1x8xf32>
    %cst_7 = arith.constant 1.000000e+00 : f32
    %21 = vector.broadcast %cst_7 : f32 to vector<1x8xf32>
    %22 = arith.subf %21, %20 : vector<1x8xf32>
    %23 = arith.mulf %22, %22 : vector<1x8xf32>
    %cst_8 = arith.constant 0.000000e+00 : f32
    %24 = vector.broadcast %cst_8 : f32 to vector<1x8xf32>
    %25 = arith.subf %24, %2 : vector<1x8xf32>
    %26 = arith.mulf %25, %23 : vector<1x8xf32>
    %27 = arith.mulf %26, %19 : vector<1x8xf32>
    %c0_9 = arith.constant 0 : index
    %c0_10 = arith.constant 0 : index
    %28 = vector.load %arg4[%c0_9, %c0_10] : memref<1x8xf32, #tpu.memory_space<vmem>>, vector<1x8xf32>
    tpu.vector_store %arg4[%c0_9, %c0_10], %27 {strides = array<i32>} : memref<1x8xf32, #tpu.memory_space<vmem>>, vector<1x8xf32>,
    return
  }
  func.func @transform_0(%arg0: i32) -> (i32, i32) {
    %c0_i32 = arith.constant 0 : i32
    %c0_i32_0 = arith.constant 0 : i32
    return %c0_i32, %arg0 : i32, i32
  }
  func.func @transform_1(%arg0: i32) -> (i32, i32) {
    %c0_i32 = arith.constant 0 : i32
    %c0_i32_0 = arith.constant 0 : i32
    return %c0_i32, %arg0 : i32, i32
  }
  func.func @transform_2(%arg0: i32) -> (i32, i32) {
    %c0_i32 = arith.constant 0 : i32
    %c0_i32_0 = arith.constant 0 : i32
    return %c0_i32, %arg0 : i32, i32
  }
  func.func @transform_3(%arg0: i32) -> (i32, i32) {
    %c0_i32 = arith.constant 0 : i32
    %c0_i32_0 = arith.constant 0 : i32
    return %c0_i32, %arg0 : i32, i32
  }
}

</mosaic_0001>

<bundles_post_ra>
// kernel: tpu_custom_call.1
= control target key start
LH: loop header
LB: loop body
LE: loop exit
PB: predicated region body
PF: predicated region fallthrough
CT: control target
= control target key end

     0   :  { %vm39_vm0 = vcmask 64512   ;;  %v21_v8 = vlaneseq  ;;  %s223_s0 = inlined_call_operand.vmem [shape: f32[32,8], index: 0, kind: input, shape index: {}]   ;;  %s224_s1 = inlined_call_operand.vmem [shape: s32[1,8], index: 1, kind: input, shape index: {}]   ;;  %s225_s2 = inlined_call_operand.vmem [shape: f32[1,8], index: 2, kind: input, shape index: {}]   ;;  %s226_s3 = inlined_call_operand.hbm [shape: f32[1,8], index: 3, kind: output, shape index: {}]  }
   0x1   :  { %v15_v0 = vld [vmem:[%s223_s0] sm:$0xff]  ;;  %v16_v1 = vld [vmem:[%s223_s0 + $0x8] sm:$0xff]  ;;  %v17_v2 = vld [vmem:[%s223_s0 + $0x10] sm:$0xff] }
   0x2   :  { %v18_v3 = vld [vmem:[%s223_s0 + $0x18] sm:$0xff]  ;;  %v40_v4 = vsel %vm39_vm0, %v15_v0, -inf  ;;  %v41_v5 = vsel %vm39_vm0, %v16_v1, -inf  ;;  %v42_v6 = vsel %vm39_vm0, %v17_v2, -inf }
   0x3   :  { %v43_v7 = vsel %vm39_vm0, %v18_v3, -inf  ;;  %v44_v9 = vmax.f32 %v40_v4, %v41_v5 }
   0x4   :  { %v45_v10 = vmax.f32 %v42_v6, %v43_v7 }
   0x5   :  { %8 = vsyncpa [#allocation3], 0  ;;  %v22_v12 = vshrl.u32 %v21_v8, 7  ;;  %v129_v17 = vld [vmem:[%s224_s1] ss:$0 sm:$0xff]  ;;  %v168_v23 = vmov 0.0  }
   0x6   :  { %v46_v11 = vmax.f32 %v44_v9, %v45_v10  ;;  %v20_v10 = vld [vmem:[%s225_s2] sm:$0x1]  ;;  %s169_s22 = smov [#allocation2]   ;;  %s114_s26 = sshll.u32 %s226_s3, 4  ;;  %vm105_vm5 = vcmask 57344   ;;  %s115_s26 = int_to_ptr.hbm [resolvable:$true] %s114_s26 }
   0x7   :  { %v23_v15 = vadd.s32 8, %v22_v12  ;;  %v24_v16 = vadd.s32 16, %v22_v12  ;;  %v25_v19 = vadd.s32 24, %v22_v12  ;;  %vm27_vm1 = vcmp.eq.s32.totalorder %v22_v12, %v129_v17  ;;  %s112_s23 = sshll.u32 %s169_s22, 4  ;;  %s113_s23 = int_to_ptr.vmem [resolvable:$true] %s112_s23 }
   0x8   :  { %v47_v13 = vrot.slane %v46_v11, 4  ;;  %v123_v24 = vsel %vm27_vm1, 1.0, %v168_v23 }
   0x9   :  { %vm28_vm2 = vcmp.eq.s32.totalorder %v23_v15, %v129_v17  ;;  %vm29_vm3 = vcmp.eq.s32.totalorder %v24_v16, %v129_v17  ;;  %vm30_vm4 = vcmp.eq.s32.totalorder %v25_v19, %v129_v17 }
   0xa   :  { %v48_v14 = vmax.f32 %v46_v11, %v47_v13  ;;  %v124_v25 = vsel %vm28_vm2, 1.0, %v168_v23  ;;  %v125_v26 = vsel %vm29_vm3, 1.0, %v168_v23  ;;  %v126_v31 = vsel %vm30_vm4, 1.0, %v168_v23 }
   0xb   :  { %v102_v13 = vsub.f32 0.0, %v20_v10 }
   0xc   :  { %v49_v18 = vrot.slane %v48_v14, 2 }
   0xe   :  { %v50_v20 = vmax.f32 %v48_v14, %v49_v18 }
  0x10   :  { %v51_v21 = vrot.slane %v50_v20, 1 }
  0x12   :  { %v52_v22 = vmax.f32 %v50_v20, %v51_v21 }
  0x14   :  { %v53_v27 = vsub.f32 %v15_v0, %v52_v22  ;;  %v54_v28 = vsub.f32 %v16_v1, %v52_v22  ;;  %v55_v29 = vsub.f32 %v17_v2, %v52_v22  ;;  %v56_v30 = vsub.f32 %v18_v3, %v52_v22 }
  0x16   :  { %v57_v32 = vmul.f32 1.442695, %v53_v27  ;;  %v59_v33 = vmul.f32 1.442695, %v54_v28  ;;  %v61_v34 = vmul.f32 1.442695, %v55_v29  ;;  %v80_v35 = vmul.f32 %v123_v24, %v53_v27 }
  0x17   :  { %v63_v36 = vmul.f32 1.442695, %v56_v30  ;;  %v81_v37 = vmul.f32 %v124_v25, %v54_v28  ;;  %v82_v38 = vmul.f32 %v125_v26, %v55_v29  ;;  %v83_v40 = vmul.f32 %v126_v31, %v56_v30 }
  0x18   :  { %130 = vpow2.f32 %v57_v32  ;;  %v84_v39 = vsel %vm39_vm0, %v80_v35, 0.0 }
  0x19   :  { %132 = vpow2.f32 %v59_v33  ;;  %v85_v41 = vsel %vm39_vm0, %v81_v37, 0.0  ;;  %v87_v42 = vsel %vm39_vm0, %v82_v38, 0.0  ;;  %v89_v45 = vsel %vm39_vm0, %v83_v40, 0.0 }
  0x1a   :  { %134 = vpow2.f32 %v61_v34  ;;  %v86_v43 = vadd.f32 %v85_v41, %v84_v39 }
  0x1b   :  { %136 = vpow2.f32 %v63_v36 }
  0x1c   :  { %v88_v44 = vadd.f32 %v87_v42, %v86_v43 }
  0x1e   :  { %v131_v46 = vpop.eup %130  ;;  %v90_v51 = vadd.f32 %v89_v45, %v88_v44 }
  0x1f   :  { %v133_v47 = vpop.eup %132  ;;  %v65_v48 = vsel %vm39_vm0, %v131_v46, 0.0 }
  0x20   :  { %v135_v49 = vpop.eup %134  ;;  %v66_v50 = vsel %vm39_vm0, %v133_v47, 0.0  ;;  %v91_v57 = vrot.slane %v90_v51, 4 }
  0x21   :  { %v137_v52 = vpop.eup %136  ;;  %v67_v53 = vadd.f32 %v66_v50, %v65_v48  ;;  %v68_v54 = vsel %vm39_vm0, %v135_v49, 0.0 }
  0x22   :  { %v70_v55 = vsel %vm39_vm0, %v137_v52, 0.0  ;;  %v92_v60 = vadd.f32 %v91_v57, %v90_v51 }
  0x23   :  { %v69_v56 = vadd.f32 %v68_v54, %v67_v53 }
  0x24   :  { %v93_v63 = vrot.slane %v92_v60, 2 }
  0x25   :  { %v71_v58 = vadd.f32 %v70_v55, %v69_v56 }
  0x26   :  { %v94_v2 = vadd.f32 %v93_v63, %v92_v60 }
  0x27   :  { %v72_v59 = vrot.slane %v71_v58, 4 }
  0x28   :  { %v95_v4 = vrot.slane %v94_v2, 1 }
  0x29   :  { %v73_v61 = vadd.f32 %v72_v59, %v71_v58 }
  0x2a   :  { %v96_v5 = vadd.f32 %v95_v4, %v94_v2 }
  0x2b   :  { %v74_v62 = vrot.slane %v73_v61, 2 }
  0x2d   :  { %v75_v0 = vadd.f32 %v74_v62, %v73_v61 }
  0x2f   :  { %v76_v1 = vrot.slane %v75_v0, 1 }
  0x31   :  { %v77_v3 = vadd.f32 %v76_v1, %v75_v0 }
  0x33   :  { %138 = vlog2.f32 %v77_v3 }
  0x39   :  { %v139_v6 = vpop.eup %138 }
  0x3a   :  { %v79_v7 = vmul.f32 0.6931472, %v139_v6 }
  0x3c   :  { %v97_v8 = vsub.f32 %v96_v5, %v79_v7 }
  0x3e   :  { %v98_v9 = vmul.f32 1.442695, %v97_v8 }
  0x40   :  { %140 = vpow2.f32 %v98_v9 }
  0x46   :  { %v141_v11 = vpop.eup %140 }
  0x47   :  { %v100_v12 = vsub.f32 1.0, %v141_v11 }
  0x49   :  { %v101_v14 = vmul.f32 %v100_v12, %v100_v12 }
  0x4b   :  { %v103_v15 = vmul.f32 %v102_v13, %v101_v14 }
  0x4d   :  { %v104_v16 = vmul.f32 %v103_v15, %v97_v8 }
  0x4f   :  { %106 = vst.msk [vmem:[#allocation2] sm:$0x1] %vm105_vm5, %v104_v16 }
  0x50   :  { %117 = dma.vmem_to_hbm [thread:$0]  %s113_s23, 16, %s115_s26, [#allocation3]  }
  0x51   :  { %166 = dma.done.wait [#allocation3], 16  }
  0x52   :  { %167 = vsyncadd [#allocation3], 4294967280 }
  0x53   :  { %122 = vsyncpa [#allocation3], 1 }

</bundles_post_ra>
